<compile_context>
chip_gen: v6e
topology: v6e:2x2x1
jax: 0.10.0
libtpu: 0.0.40
codegen_flags: <defaults>
</compile_context>

<pallas_src>
import jax
import jax.numpy as jnp
from jax.experimental import pallas as pl
from jax.experimental.pallas import tpu as pltpu


def _round_up(x, m):
    return ((x + m - 1) // m) * m


def _cdiv(a, b):
    return (a + b - 1) // b


def _pick_tile(dim, cap, align):
    """Largest tile <= cap (multiple of `align`) that keeps padding waste small."""
    n_blocks = _cdiv(max(dim, 1), cap)
    return min(_round_up(_cdiv(dim, n_blocks), align), cap)


def _fused_linear_relu_kernel(x_ref, w_ref, b_ref, o_ref, acc_ref):
    # x_ref  : (tm, tk)  activation tile (compute dtype, e.g. bf16)
    # w_ref  : (tk, tn)  weight tile, pre-transposed to (in, out)
    # b_ref  : (1,  tn)  bias tile (f32)
    # o_ref  : (tm, tn)  output tile
    # acc_ref: (tm, tn)  f32 accumulator scratch, persists across the K axis
    k = pl.program_id(2)

    @pl.when(k == 0)
    def _():
        acc_ref[...] = jnp.zeros_like(acc_ref)

    acc_ref[...] += jnp.dot(
        x_ref[...], w_ref[...], preferred_element_type=jnp.float32)

    @pl.when(k == pl.num_programs(2) - 1)
    def _():
        y = acc_ref[...] + b_ref[...]
        o_ref[...] = jnp.maximum(y, 0.0).astype(o_ref.dtype)


def prepare_params(weight, bias, *, compute_dtype=jnp.bfloat16,
                   tile_n=None, tile_k=None):
    """One-time (out-of-hot-path) weight/bias preparation.

    weight: (out_dim, in_dim) as in torch.nn.Linear.
    Returns a dict holding the transposed/cast/padded weight (Kp, Np), the
    padded f32 bias (1, Np), and the static N/K tile sizes, so the per-call
    wrapper only touches the activation.
    """
    out_dim, in_dim = weight.shape

    tn = tile_n if tile_n is not None else _pick_tile(out_dim, 512, 128)
    tk = tile_k if tile_k is not None else _pick_tile(in_dim, 1024, 128)
    assert tn % 128 == 0 and tk % 128 == 0, "tile_n / tile_k must be multiples of 128"

    Np = _round_up(out_dim, tn)
    # v7x has 2 TensorCores: if N would be a single block but splits cleanly
    # into two 128-multiples, halve tn so the parallel N axis has >= 2 blocks.
    if tile_n is None and Np // tn < 2 and Np >= 256 and (Np // 2) % 128 == 0:
        tn = Np // 2
    Kp = _round_up(in_dim, tk)

    w_t = jnp.asarray(weight).T.astype(compute_dtype)           # (in, out)
    w_t = jnp.pad(w_t, ((0, Kp - in_dim), (0, Np - out_dim)))   # (Kp, Np)
    b = jnp.pad(jnp.asarray(bias).astype(jnp.float32),
                (0, Np - out_dim)).reshape(1, Np)

    return dict(w=w_t, b=b, in_dim=in_dim, out_dim=out_dim,
                tile_n=tn, tile_k=tk, compute_dtype=compute_dtype)


def thresholded_linear(x, params, *, tile_m=None):
    """relu(x @ W.T + b) using prepared params (see prepare_params)."""
    w = params["w"]                        # (Kp, Np), compute dtype
    b = params["b"]                        # (1, Np), f32
    in_dim, out_dim = params["in_dim"], params["out_dim"]
    tn, tk = params["tile_n"], params["tile_k"]
    compute_dtype = params["compute_dtype"]
    Kp, Np = w.shape

    orig_shape = x.shape
    out_dtype = x.dtype
    assert orig_shape[-1] == in_dim

    x2 = x.reshape(-1, in_dim).astype(compute_dtype)
    B = x2.shape[0]

    # tm: scale with batch up to 512, minimize M-padding waste, align to the
    # sublane packing (bf16 packs 16 rows per vreg sublane group, f32 packs 8).
    m_align = 16 if jnp.dtype(compute_dtype).itemsize < 4 else 8
    tm = tile_m if tile_m is not None else _pick_tile(B, 512, m_align)
    assert tm % m_align == 0, f"tile_m must be a multiple of {m_align}"

    M = _round_up(B, tm)
    if (M, Kp) != x2.shape:
        # Zero K-padding contributes 0 to the dot; padded M rows are sliced off.
        x2 = jnp.pad(x2, ((0, M - B), (0, Kp - in_dim)))

    grid = (M // tm, Np // tn, Kp // tk)

    # Scoped-VMEM limit sized from the real double-buffered footprint, capped at
    # 48 MiB so the config is safe on v7x (64 MiB VMEM) as well as v5e/v6e.
    c_bytes = jnp.dtype(compute_dtype).itemsize
    o_bytes = jnp.dtype(out_dtype).itemsize
    footprint = (2 * (tm * tk * c_bytes + tk * tn * c_bytes + tn * 4)
                 + 2 * tm * tn * o_bytes + tm * tn * 4)
    vmem_limit = int(min(max(2 * footprint, 32 << 20), 48 << 20))

    out = pl.pallas_call(
        _fused_linear_relu_kernel,
        out_shape=jax.ShapeDtypeStruct((M, Np), out_dtype),
        grid_spec=pltpu.PrefetchScalarGridSpec(
            num_scalar_prefetch=0,
            grid=grid,
            in_specs=[
                pl.BlockSpec((tm, tk), lambda i, j, k: (i, k)),   # x
                pl.BlockSpec((tk, tn), lambda i, j, k: (k, j)),   # W.T (in,out)
                pl.BlockSpec((1, tn), lambda i, j, k: (0, j)),    # bias
            ],
            out_specs=pl.BlockSpec((tm, tn), lambda i, j, k: (i, j)),
            scratch_shapes=[pltpu.VMEM((tm, tn), jnp.float32)],
        ),
        compiler_params=pltpu.CompilerParams(
            dimension_semantics=("parallel", "parallel", "arbitrary"),
            vmem_limit_bytes=vmem_limit,
        ),
    )(x2, w, b)

    out = out[:B, :out_dim]
    return out.reshape(*orig_shape[:-1], out_dim)


if __name__ == "__main__":
    key = jax.random.PRNGKey(0)

    # --- 1) Module-spec shape: Linear(32, 32), batch=8, default bf16 path ----
    B, in_dim, out_dim = 8, 32, 32
    kx, kw, kb = jax.random.split(key, 3)
    bound = 1.0 / jnp.sqrt(jnp.float32(in_dim))
    x = jax.random.normal(kx, (B, in_dim), dtype=jnp.float32)
    weight = jax.random.uniform(kw, (out_dim, in_dim), jnp.float32, -bound, bound)
    bias = jax.random.uniform(kb, (out_dim,), jnp.float32, -bound, bound)

    ref = jnp.maximum(x @ weight.T + bias, 0.0)

    params_bf16 = prepare_params(weight, bias)                 # bf16 default
    y = jax.block_until_ready(thresholded_linear(x, params_bf16))
    assert y.shape == (B, out_dim) and y.dtype == x.dtype
    # bf16 MXU path -> loosened tolerance vs the f32 reference.
    assert jnp.allclose(y, ref, atol=3e-2, rtol=3e-2)

    # --- 2) f32 compute path: tight structural-correctness check -------------
    params_f32 = prepare_params(weight, bias, compute_dtype=jnp.float32)
    y32 = jax.block_until_ready(thresholded_linear(x, params_f32))
    assert jnp.allclose(y32, ref, atol=1e-5, rtol=1e-5)

    # --- 3) Ragged shape exercising the multi-block tiled path (padding, K>1) -
    B2, in2, out2 = 200, 1300, 640
    k2x, k2w, k2b = jax.random.split(jax.random.PRNGKey(1), 3)
    bound2 = 1.0 / jnp.sqrt(jnp.float32(in2))
    x2 = jax.random.normal(k2x, (B2, in2), dtype=jnp.float32)
    w2 = jax.random.uniform(k2w, (out2, in2), jnp.float32, -bound2, bound2)
    b2 = jax.random.uniform(k2b, (out2,), jnp.float32, -bound2, bound2)
    ref2 = jnp.maximum(x2 @ w2.T + b2, 0.0)

    p2 = prepare_params(w2, b2)                                # bf16 default
    y2 = jax.block_until_ready(thresholded_linear(x2, p2))
    assert y2.shape == (B2, out2)
    assert jnp.allclose(y2, ref2, atol=5e-2, rtol=5e-2)

    print("KERNEL_OK")
</pallas_src>

<mosaic_0001>
module attributes {stable_mosaic.version = 11 : i64} {
  func.func @_fused_linear_relu_kernel(%arg0: i32, %arg1: i32, %arg2: i32, %arg3: memref<16x128xbf16, #tpu.memory_space<vmem>>, %arg4: memref<128x128xbf16, #tpu.memory_space<vmem>>, %arg5: memref<1x128xf32, #tpu.memory_space<vmem>>, %arg6: memref<16x128xf32, #tpu.memory_space<vmem>>, %arg7: memref<16x128xf32, #tpu.memory_space<vmem>>) attributes {dimension_semantics = [#tpu.dimension_semantics<parallel>, #tpu.dimension_semantics<parallel>, #tpu.dimension_semantics<arbitrary>], iteration_bounds = array<i64: 1, 1, 1>, scalar_prefetch = 0 : i64, scratch_operands = 1 : i64, tpu.core_type = #tpu.core_type<tc>, window_params = [{transform_indices = @transform_0, window_bounds = array<i64: 16, 128>}, {transform_indices = @transform_1, window_bounds = array<i64: 128, 128>}, {transform_indices = @transform_2, window_bounds = array<i64: 1, 128>}, {transform_indices = @transform_3, window_bounds = array<i64: 16, 128>}]} {
    %c0_i32 = arith.constant 0 : i32
    %0 = arith.cmpi eq, %arg2, %c0_i32 : i32
    %1 = arith.extui %0 : i1 to i32
    %c0_i32_0 = arith.constant 0 : i32
    %2 = arith.cmpi ne, %1, %c0_i32_0 : i32
    scf.if %2 {
      %cst_10 = arith.constant 0.000000e+00 : f32
      %12 = vector.broadcast %cst_10 : f32 to vector<16x128xf32>
      %c0_11 = arith.constant 0 : index
      %c0_12 = arith.constant 0 : index
      %13 = vector.load %arg7[%c0_11, %c0_12] : memref<16x128xf32, #tpu.memory_space<vmem>>, vector<16x128xf32>
      tpu.vector_store %arg7[%c0_11, %c0_12], %12 {strides = array<i32>} : memref<16x128xf32, #tpu.memory_space<vmem>>, vector<16x128xf32>,
    } else {
    }
    %c0 = arith.constant 0 : index
    %c0_1 = arith.constant 0 : index
    %3 = vector.load %arg7[%c0, %c0_1] : memref<16x128xf32, #tpu.memory_space<vmem>>, vector<16x128xf32>
    %c0_2 = arith.constant 0 : index
    %c0_3 = arith.constant 0 : index
    %4 = vector.load %arg3[%c0_2, %c0_3] : memref<16x128xbf16, #tpu.memory_space<vmem>>, vector<16x128xbf16>
    %c0_4 = arith.constant 0 : index
    %c0_5 = arith.constant 0 : index
    %5 = vector.load %arg4[%c0_4, %c0_5] : memref<128x128xbf16, #tpu.memory_space<vmem>>, vector<128x128xbf16>
    %cst = arith.constant dense<0.000000e+00> : vector<16x128xf32>
    %6 = tpu.matmul %4, %5, %cst {dimension_numbers = #tpu.dot_dimension_numbers<[1], [0], [0], [1], [0, 0, 1, 1], [], []>} : vector<16x128xbf16>, vector<128x128xbf16>, vector<16x128xf32> -> vector<16x128xf32>
    %7 = arith.addf %3, %6 : vector<16x128xf32>
    %c0_6 = arith.constant 0 : index
    %c0_7 = arith.constant 0 : index
    %8 = vector.load %arg7[%c0_6, %c0_7] : memref<16x128xf32, #tpu.memory_space<vmem>>, vector<16x128xf32>
    tpu.vector_store %arg7[%c0_6, %c0_7], %7 {strides = array<i32>} : memref<16x128xf32, #tpu.memory_space<vmem>>, vector<16x128xf32>,
    %c0_i32_8 = arith.constant 0 : i32
    %9 = arith.cmpi eq, %arg2, %c0_i32_8 : i32
    %10 = arith.extui %9 : i1 to i32
    %c0_i32_9 = arith.constant 0 : i32
    %11 = arith.cmpi ne, %10, %c0_i32_9 : i32
    scf.if %11 {
      %c0_10 = arith.constant 0 : index
      %c0_11 = arith.constant 0 : index
      %12 = vector.load %arg7[%c0_10, %c0_11] : memref<16x128xf32, #tpu.memory_space<vmem>>, vector<16x128xf32>
      %c0_12 = arith.constant 0 : index
      %c0_13 = arith.constant 0 : index
      %13 = vector.load %arg5[%c0_12, %c0_13] : memref<1x128xf32, #tpu.memory_space<vmem>>, vector<1x128xf32>
      %14 = vector.broadcast %13 : vector<1x128xf32> to vector<16x128xf32>
      %15 = arith.addf %12, %14 : vector<16x128xf32>
      %cst_14 = arith.constant 0.000000e+00 : f32
      %16 = vector.broadcast %cst_14 : f32 to vector<16x128xf32>
      %17 = arith.maximumf %15, %16 : vector<16x128xf32>
      %c0_15 = arith.constant 0 : index
      %c0_16 = arith.constant 0 : index
      %18 = vector.load %arg6[%c0_15, %c0_16] : memref<16x128xf32, #tpu.memory_space<vmem>>, vector<16x128xf32>
      tpu.vector_store %arg6[%c0_15, %c0_16], %17 {strides = array<i32>} : memref<16x128xf32, #tpu.memory_space<vmem>>, vector<16x128xf32>,
    } else {
    }
    return
  }
  func.func @transform_0(%arg0: i32, %arg1: i32, %arg2: i32) -> (i32, i32) {
    %c0_i32 = arith.constant 0 : i32
    return %arg0, %arg2 : i32, i32
  }
  func.func @transform_1(%arg0: i32, %arg1: i32, %arg2: i32) -> (i32, i32) {
    %c0_i32 = arith.constant 0 : i32
    return %arg2, %arg1 : i32, i32
  }
  func.func @transform_2(%arg0: i32, %arg1: i32, %arg2: i32) -> (i32, i32) {
    %c0_i32 = arith.constant 0 : i32
    %c0_i32_0 = arith.constant 0 : i32
    return %c0_i32, %arg1 : i32, i32
  }
  func.func @transform_3(%arg0: i32, %arg1: i32, %arg2: i32) -> (i32, i32) {
    %c0_i32 = arith.constant 0 : i32
    return %arg0, %arg1 : i32, i32
  }
}

</mosaic_0001>

<bundles_post_ra>
// kernel: tpu_custom_call.1
= control target key start
LH: loop header
LB: loop body
LE: loop exit
PB: predicated region body
PF: predicated region fallthrough
CT: control target
= control target key end

     0   :  { %8 = vsyncpa [#allocation4], 0  ;;  %s369_s0 = inlined_call_operand.hbm [shape: bf16[16,128], index: 0, kind: input, shape index: {}]   ;;  %s370_s1 = inlined_call_operand.hbm [shape: bf16[128,128], index: 1, kind: input, shape index: {}]   ;;  %s371_s2 = inlined_call_operand.vmem [shape: f32[1,128], index: 2, kind: input, shape index: {}]   ;;  %s372_s3 = inlined_call_operand.hbm [shape: f32[16,128], index: 3, kind: output, shape index: {}]  }
   0x1   :  { %9 = vsyncpa [#allocation7], 0 }
   0x2   :  { %10 = vsyncpa [#allocation5], 0  ;;  %s328_s12 = smov [#allocation3]  }
   0x3   :  { %s16_s13 = sshll.u32 %s328_s12, 4  ;;  %s17_s13 = int_to_ptr.vmem [resolvable:$true] %s16_s13 }
   0x4   :  { %s270_s14 = scalar_lea.vmem %s17_s13, 128  ;;  %p275_p1 = scmp.lt.s32.totalorder %s17_s13, %s17_s13 }
   0x5   :  { %p271_p0 = scmp.ne.s32.totalorder %s17_s13, %s270_s14  ;;  %p276_p2 = scmp.lt.s32.totalorder %s270_s14, %s270_s14 }
   0x7   :  { %p277_p3 = por %p276_p2, %p275_p1 }
   0x9   :  { %p278_p4 = pnand %p277_p3, %p271_p0 }
   0xb   :  { %281 = shalt.err (!%p278_p4)
}
   0xc   :  { %s329_s15 = smov 64   ;;  %s330_s16 = smov 4  }
   0xd   :  { %22 = dma.hbm_to_vmem [thread:$0]  %s369_s0, 128, %s17_s13, [#allocation4], %s329_s15, %s329_s15, %s330_s16  }
   0xe   :  { %s331_s19 = smov [#allocation6]  }
   0xf   :  { %s28_s20 = sshll.u32 %s331_s19, 4  ;;  %s29_s20 = int_to_ptr.vmem [resolvable:$true] %s28_s20 }
  0x10   :  { %s290_s21 = scalar_lea.vmem %s29_s20, 1024  ;;  %p295_p6 = scmp.lt.s32.totalorder %s29_s20, %s29_s20 }
  0x11   :  { %p291_p5 = scmp.ne.s32.totalorder %s29_s20, %s290_s21  ;;  %p296_p7 = scmp.lt.s32.totalorder %s290_s21, %s290_s21 }
  0x13   :  { %p297_p8 = por %p296_p7, %p295_p6 }
  0x15   :  { %p298_p9 = pnand %p297_p8, %p291_p5 }
  0x17   :  { %301 = shalt.err (!%p298_p9)
}
  0x18   :  { %34 = dma.hbm_to_vmem [thread:$0]  %s370_s1, 1024, %s29_s20, [#allocation7], %s329_s15, %s329_s15, %s330_s16  }
  0x19   :  { %322 = dma.done.wait [#allocation4], 128  }
  0x1a   :  { %323 = vsyncadd [#allocation4], 4294967168 }
  0x1b   :  { %324 = dma.done.wait [#allocation7], 1024  }
  0x1c   :  { %325 = vsyncadd [#allocation7], 4294966272  ;;  %v332_v0 = vmov 0.0   ;;  %vm333_vm0 = vmmov 0   ;;  %v253_v1 = vld [vmem:[#allocation6 + $0x38] sm:$0xff]   ;;  %v254_v2 = vld [vmem:[#allocation6 + $0x30] sm:$0xff]  }
  0x1d   :  { %224 = vmatprep.subr.bf16.mxu0 %v332_v0  ;;  %240 = vmatprep.mubr.msk.bf16.mxu0 %vm333_vm0, %v332_v0  ;;  %v255_v3 = vld [vmem:[#allocation6 + $0x28] sm:$0xff]   ;;  %v256_v4 = vld [vmem:[#allocation6 + $0x20] sm:$0xff]   ;;  %v257_v5 = vld [vmem:[#allocation6 + $0x18] sm:$0xff]   ;;  %s334_s24 = smov [#allocation8]  }
  0x1e   :  { %225 = vmatpush3.bf16.msra.mxu0 %v253_v1  ;;  %v258_v6 = vld [vmem:[#allocation6 + $0x10] sm:$0xff]   ;;  %v259_v7 = vld [vmem:[#allocation6 + $0x8] sm:$0xff]   ;;  %v260_v8 = vld [vmem:[#allocation6] sm:$0xff]   ;;  %s192_s25 = sshll.u32 %s334_s24, 4  ;;  %s193_s25 = int_to_ptr.vmem [resolvable:$true] %s192_s25 }
  0x1f   :  { %226 = vmatprep.subr.bf16.mxu0 %v332_v0  ;;  %v261_v9 = vld [vmem:[#allocation3] sm:$0xff]   ;;  %s302_s26 = scalar_lea.vmem %s193_s25, 256  ;;  %p307_p11 = scmp.lt.s32.totalorder %s193_s25, %s193_s25 }
  0x20   :  { %v214_v10 = vld [vmem:[%s371_s2] ss:$0 sm:$0xff]  ;;  %p303_p10 = scmp.ne.s32.totalorder %s193_s25, %s302_s26  ;;  %p308_p12 = scmp.lt.s32.totalorder %s302_s26, %s302_s26 }
  0x22   :  { %227 = vmatpush3.bf16.msra.mxu0 %v254_v2  ;;  %p309_p13 = por %p308_p12, %p307_p11 }
  0x23   :  { %228 = vmatprep.subr.bf16.mxu0 %v332_v0 }
  0x24   :  { %p310_p0 = pnand %p309_p13, %p303_p10 }
  0x26   :  { %229 = vmatpush3.bf16.msra.mxu0 %v255_v3 }
  0x27   :  { %230 = vmatprep.subr.bf16.mxu0 %v332_v0 }
  0x2a   :  { %231 = vmatpush3.bf16.msra.mxu0 %v256_v4 }
  0x2b   :  { %232 = vmatprep.subr.bf16.mxu0 %v332_v0 }
  0x2e   :  { %233 = vmatpush3.bf16.msra.mxu0 %v257_v5 }
  0x2f   :  { %234 = vmatprep.subr.bf16.mxu0 %v332_v0 }
  0x32   :  { %235 = vmatpush3.bf16.msra.mxu0 %v258_v6 }
  0x33   :  { %236 = vmatprep.subr.bf16.mxu0 %v332_v0 }
  0x36   :  { %237 = vmatpush3.bf16.msra.mxu0 %v259_v7 }
  0x37   :  { %238 = vmatprep.subr.bf16.mxu0 %v332_v0 }
  0x3a   :  { %239 = vmatpush3.bf16.msra.mxu0 %v260_v8 }
  0x3d   :  { %241 = vmatmul.mubr.bf16.vlgmr.msra.gmra.mxu0 %v261_v9 }
  0xfd   :  { %v158_v11 = vpop.f32.mrf.mxu0 }
  0xfe   :  { %v181_v12 = vadd.f32 %v214_v10, %v158_v11 }
  0xff   :  { %v242_v13 = vpop.f32.mrf.mxu0 }
 0x100   :  { %v183_v14 = vmax.f32 %v181_v12, 0.0 }
 0x101   :  { %v161_v15 = vpop.f32.mrf.mxu0 }
 0x102   :  { %185 = vst [vmem:[#allocation8] sm:$0xff] %v183_v14  ;;  %v182_v16 = vadd.f32 %v214_v10, %v161_v15 }
 0x103   :  { %v243_v17 = vpop.f32.mrf.mxu0 }
 0x104   :  { %v184_v18 = vmax.f32 %v182_v16, 0.0 }
 0x106   :  { %186 = vst [vmem:[#allocation8 + $0x8] sm:$0xff] %v184_v18 }
 0x107   :  { %313 = shalt.err (!%p310_p0)
}
 0x108   :  { %s335_s2 = smov 128   ;;  %s336_s27 = smov 8  }
 0x109   :  { %198 = dma.vmem_to_hbm [thread:$0]  %s193_s25, 256, %s372_s3, [#allocation5], %s335_s2, %s335_s2, %s336_s27  }
 0x10a   :  { %326 = dma.done.wait [#allocation5], 256  }
 0x10b   :  { %327 = vsyncadd [#allocation5], 4294967040 }
 0x10c   :  { %202 = vsyncpa [#allocation4], 1 }
 0x10d   :  { %203 = vsyncpa [#allocation7], 1 }
 0x10e   :  { %204 = vsyncpa [#allocation5], 1 }

</bundles_post_ra>
